<compile_context>
chip_gen: v5e
topology: v5e:2x2
jax: 0.10.0
libtpu: 0.0.40
codegen_flags: <defaults>
</compile_context>

<pallas_src>
import functools

import jax
import jax.numpy as jnp
from jax.experimental import pallas as pl
from jax.experimental.pallas import tpu as pltpu


def _multi_bbox_iou(b1, b2):
    """IoU for center-format boxes (..., [x, y, w, h]) == YOLO.multi_bbox_iou."""
    x1, y1, w1, h1 = b1[..., 0], b1[..., 1], b1[..., 2], b1[..., 3]
    x2, y2, w2, h2 = b2[..., 0], b2[..., 1], b2[..., 2], b2[..., 3]
    mx = jnp.minimum(x1 - w1 * 0.5, x2 - w2 * 0.5)
    Mx = jnp.maximum(x1 + w1 * 0.5, x2 + w2 * 0.5)
    my = jnp.minimum(y1 - h1 * 0.5, y2 - h2 * 0.5)
    My = jnp.maximum(y1 + h1 * 0.5, y2 + h2 * 0.5)
    uw = Mx - mx
    uh = My - my
    cw = w1 + w2 - uw
    ch = h1 + h2 - uh
    carea = jnp.where((cw <= 0) | (ch <= 0), 0.0, cw * ch)
    uarea = w1 * h1 + w2 * h2 - carea
    return carea / uarea


def _pick_row_chunk(rt, hw):
    """Strip-mining chunk: keep ~12 live (chunk, hw) f32 temporaries inside the
    64-vreg register file so Mosaic never spills to VMEM."""
    if rt % 8 != 0:
        return rt                               # ragged single-tile case: one pass
    budget_rows = max(8, (((64 * 1024) // 12) // max(hw, 1)) // 8 * 8)
    c = min(rt, budget_rows)
    while c > 8 and rt % c != 0:
        c -= 8
    return c if rt % c == 0 else rt


def _region_loss_kernel(rowtab_ref, gridxy_ref, pred_ref, out_ref, *,
                        hw, chunk, epoch, no_object_scale, sil_thresh):
    RT = pred_ref.shape[0]                      # rows in this tile = bt * na
    nchunks = RT // chunk

    grid_x = gridxy_ref[0:1, :]                 # (1, hw) cell column index
    grid_y = gridxy_ref[1:2, :]                 # (1, hw) cell row index
    noobj = jnp.float32(no_object_scale)
    thresh = jnp.float32(sil_thresh)

    def chunk_sums(r0):
        rows = pl.ds(r0, chunk)
        rt = rowtab_ref[rows, :]                # (chunk, 6) per-row scalars
        gx, gy = rt[:, 0:1], rt[:, 1:2]
        gw, gh = rt[:, 2:3], rt[:, 3:4]
        aw, ah = rt[:, 4:5], rt[:, 5:6]         # per-row anchor w/h (DMA'd input)

        def channel(ci):                        # lane-dense channel slab
            return pred_ref[rows, pl.ds(ci * hw, hw)].astype(jnp.float32)

        px = jax.nn.sigmoid(channel(0))
        py = jax.nn.sigmoid(channel(1))
        pw = channel(2)
        ph = channel(3)
        pconf = jax.nn.sigmoid(channel(4))

        # grid-offset predicted boxes
        bx = px + grid_x
        by = py + grid_y
        bw = jnp.exp(pw) * aw
        bh = jnp.exp(ph) * ah

        # IoU(gt, pred_ofs) > sil_thresh, rewritten without the per-elem divide
        mx = jnp.minimum(gx - gw * 0.5, bx - bw * 0.5)
        Mx = jnp.maximum(gx + gw * 0.5, bx + bw * 0.5)
        my = jnp.minimum(gy - gh * 0.5, by - bh * 0.5)
        My = jnp.maximum(gy + gh * 0.5, by + bh * 0.5)
        cw = gw + bw - (Mx - mx)
        chh = gh + bh - (My - my)
        carea = jnp.where((cw <= 0) | (chh <= 0), 0.0, cw * chh)
        uarea = gw * gh + bw * bh - carea
        high_iou = carea > thresh * uarea

        # dense conf loss (target == 0 everywhere; the single target-cell
        # correction is applied on the glue path)
        cmask = jnp.where(high_iou, 0.0, noobj)

        def rsum(x):                            # (chunk, hw) -> (1, 1)
            return jnp.sum(x, keepdims=True)

        sc = rsum(cmask * pconf * pconf)
        if epoch < 1:
            sx = rsum((px - 0.5) ** 2)
            sy = rsum((py - 0.5) ** 2)
            sw = rsum(pw * pw)
            sh = rsum(ph * ph)
        else:
            z = jnp.zeros((1, 1), jnp.float32)
            sx = sy = sw = sh = z
        return sx, sy, sw, sh, sc

    if nchunks == 1:
        comps = chunk_sums(0)
    else:
        def body(c, carry):
            r0 = pl.multiple_of(c * chunk, chunk)
            part = chunk_sums(r0)
            return tuple(a + b for a, b in zip(carry, part))
        init = tuple(jnp.zeros((1, 1), jnp.float32) for _ in range(5))
        comps = jax.lax.fori_loop(0, nchunks, body, init)

    # lane-dense (8, 128) partial-loss block: sublane c carries loss component c
    row_ids = jax.lax.broadcasted_iota(jnp.int32, (8, 128), 0)
    tile = jnp.zeros((8, 128), jnp.float32)
    for c, v in enumerate(comps):
        tile = jnp.where(row_ids == c, v, tile)
    out_ref[...] = tile


class RegionLossNoClass1BboxPallas:
    """JAX/Pallas port of RegionLoss_NoClass_1Bbox.forward."""

    def __init__(self, cfg):
        self.object_scale = float(cfg['object_scale'])
        self.no_object_scale = float(cfg['no_object_scale'])
        self.anc = [float(i) for i in cfg['anchors'].split(',')]
        self.anc_step = 2
        self.na = len(self.anc) // self.anc_step
        self.cs = float(cfg['coord_scale'])
        self.sil_thresh = float(cfg['sil_thresh'])
        self.epoch = 0
        # TODO(synk): cfg['time'] / cfg['debug'] host-side profiling prints are
        # intentionally not ported.
        self._forward = jax.jit(self._forward_impl, static_argnums=(2,))

    # ---- tiling: bt must divide bs (no pad copy); tile row count multiple of
    #      8 when multi-tile; prefer >= 2 tiles (dual-TensorCore parts) with
    #      the largest tile that keeps the pinned pred block small.
    def _batch_tile(self, bs, hw, dtype):
        na = self.na
        itemsize = jnp.dtype(dtype).itemsize
        budget = 4 * 1024 * 1024                # per pred tile (x2 for dbl-buffer)
        cands = [bt for bt in range(1, bs + 1)
                 if bs % bt == 0 and (bt == bs or (bt * na) % 8 == 0)]
        fitting = [bt for bt in cands
                   if bt * na * 5 * hw * itemsize <= budget] or [min(cands)]
        multi = [bt for bt in fitting if bs // bt >= 2]
        return max(multi or fitting)

    def __call__(self, pred, target):
        return self._forward(pred, target, self.epoch)

    def _forward_impl(self, pred, target, epoch):
        bs, C, S1, S2 = pred.shape
        assert S1 == S2, "module asserts W == H"
        S = S1
        na = self.na
        assert C == na * 5
        hw = S * S

        anc = jnp.asarray(self.anc, jnp.float32).reshape(na, 2)

        # pure reshape (no HBM copy): row r = (image r//na, anchor r%na),
        # columns = [x(hw) | y(hw) | w(hw) | h(hw) | conf(hw)]
        pred_flat = pred.reshape(bs * na, 5 * hw)

        # ---- glue: per-image scalar targets (tiny, plain JAX, same jit) ----
        t = target.astype(jnp.float32) * jnp.float32(S)        # scale to grid
        gx, gy, gw, gh = t[:, 0], t[:, 1], t[:, 2], t[:, 3]
        gi = jnp.clip(gx.astype(jnp.int32), 0, S - 1)          # clamp (x==1.0)
        gj = jnp.clip(gy.astype(jnp.int32), 0, S - 1)

        # best anchor per image (w/h IoU with anchors, centers at origin)
        gt_wh = jnp.stack([jnp.zeros_like(gw), jnp.zeros_like(gw), gw, gh],
                          -1)[:, None, :]
        anc_box = jnp.concatenate([jnp.zeros((na, 2), jnp.float32), anc],
                                  -1)[None, :, :]
        best = jnp.argmax(_multi_bbox_iou(gt_wh, anc_box),
                          axis=1).astype(jnp.int32)

        # predicted raw values at the target cell / best anchor
        loc = gj * S + gi
        bidx = jnp.arange(bs)
        p_at = pred.reshape(bs, na, 5, hw)[bidx, best, :, loc]   # (bs, 5)
        p_at = p_at.astype(jnp.float32)
        abw = anc[best, 0]
        abh = anc[best, 1]
        px_at = jax.nn.sigmoid(p_at[:, 0])
        py_at = jax.nn.sigmoid(p_at[:, 1])
        pw_at = p_at[:, 2]
        ph_at = p_at[:, 3]
        pc_at = jax.nn.sigmoid(p_at[:, 4])
        pbx = px_at + gi.astype(jnp.float32)
        pby = py_at + gj.astype(jnp.float32)
        pbw = jnp.exp(pw_at) * abw
        pbh = jnp.exp(ph_at) * abh
        tconf = _multi_bbox_iou(t, jnp.stack([pbx, pby, pbw, pbh], -1))
        tbx = gx - gi.astype(jnp.float32)
        tby = gy - gj.astype(jnp.float32)
        tbw = jnp.log(gw / abw)
        tbh = jnp.log(gh / abh)

        # per-(image, anchor) row table: [gx gy gw gh anc_w anc_h]
        rowtab = jnp.concatenate([jnp.repeat(t, na, axis=0),
                                  jnp.tile(anc, (bs, 1))], axis=1)

        # precomputed grid offsets (2, hw): [col (x), row (y)]
        idx = jnp.arange(hw, dtype=jnp.int32)
        gridxy = jnp.stack([(idx % S).astype(jnp.float32),
                            (idx // S).astype(jnp.float32)], axis=0)

        # ---- batch tiling (no pad: bt | bs) ----
        bt = self._batch_tile(bs, hw, pred.dtype)
        ntiles = bs // bt
        RT = bt * na
        chunk = _pick_row_chunk(RT, hw)

        kernel = functools.partial(
            _region_loss_kernel, hw=hw, chunk=chunk, epoch=epoch,
            no_object_scale=self.no_object_scale, sil_thresh=self.sil_thresh)

        out = pl.pallas_call(
            kernel,
            out_shape=jax.ShapeDtypeStruct((ntiles * 8, 128), jnp.float32),
            grid=(ntiles,),
            in_specs=[
                pl.BlockSpec((RT, 6), lambda i: (i, 0)),          # rowtab
                pl.BlockSpec((2, hw), lambda i: (0, 0)),          # grid offsets
                pl.BlockSpec((RT, 5 * hw), lambda i: (i, 0)),     # pred (flat)
            ],
            out_specs=pl.BlockSpec((8, 128), lambda i: (i, 0)),
            compiler_params=pltpu.CompilerParams(
                dimension_semantics=("parallel",)),
        )(rowtab, gridxy, pred_flat)

        sums = jnp.sum(out.reshape(ntiles, 8, 128)[:, :5, 0], axis=0)
        Sx, Sy, Sw, Sh, Sc = sums[0], sums[1], sums[2], sums[3], sums[4]

        # ---- single-cell corrections on the glue path ----
        half_cs = jnp.float32(0.5 * self.cs)
        mask_at = jnp.where(tconf > self.sil_thresh, 0.0, self.no_object_scale)
        loss_conf = 0.5 * (Sc + jnp.sum(self.object_scale * (pc_at - tconf) ** 2
                                        - mask_at * pc_at ** 2))
        if epoch < 1:
            loss_x = half_cs * (Sx + jnp.sum((px_at - tbx) ** 2
                                             - (px_at - 0.5) ** 2))
            loss_y = half_cs * (Sy + jnp.sum((py_at - tby) ** 2
                                             - (py_at - 0.5) ** 2))
            loss_w = half_cs * (Sw + jnp.sum((pw_at - tbw) ** 2 - pw_at ** 2))
            loss_h = half_cs * (Sh + jnp.sum((ph_at - tbh) ** 2 - ph_at ** 2))
        else:
            loss_x = half_cs * jnp.sum((px_at - tbx) ** 2)
            loss_y = half_cs * jnp.sum((py_at - tby) ** 2)
            loss_w = half_cs * jnp.sum((pw_at - tbw) ** 2)
            loss_h = half_cs * jnp.sum((ph_at - tbh) ** 2)
        loss = loss_x + loss_y + loss_w + loss_h + loss_conf
        return loss, loss_x, loss_y, loss_w, loss_h, loss_conf


def _reference_forward(mod, pred, target, epoch=0):
    """Dense pure-JAX transcription of the PyTorch forward."""
    bs, C, S, _ = pred.shape
    na = mod.na
    anc = jnp.asarray(mod.anc, jnp.float32).reshape(na, 2)
    p = pred.astype(jnp.float32).reshape(bs, na, 5, S, S)
    px = jax.nn.sigmoid(p[:, :, 0])
    py = jax.nn.sigmoid(p[:, :, 1])
    pw = p[:, :, 2]
    ph = p[:, :, 3]
    pconf = jax.nn.sigmoid(p[:, :, 4])

    yv, xv = jnp.meshgrid(jnp.arange(S), jnp.arange(S), indexing="ij")
    bx = px + xv.astype(jnp.float32)
    by = py + yv.astype(jnp.float32)
    bw = jnp.exp(pw) * anc[:, 0].reshape(1, na, 1, 1)
    bh = jnp.exp(ph) * anc[:, 1].reshape(1, na, 1, 1)

    t = target.astype(jnp.float32) * S
    gx, gy, gw, gh = t[:, 0], t[:, 1], t[:, 2], t[:, 3]
    gi = gx.astype(jnp.int32)
    gj = gy.astype(jnp.int32)

    pb = jnp.stack([bx, by, bw, bh], axis=-1)                   # (bs,na,S,S,4)
    iou = jnp.maximum(_multi_bbox_iou(t[:, None, None, None, :], pb), 0.0)
    conf_mask = jnp.where(iou > mod.sil_thresh, 0.0, mod.no_object_scale)

    gt_wh = jnp.stack([jnp.zeros_like(gw), jnp.zeros_like(gw), gw, gh],
                      -1)[:, None, :]
    anc_box = jnp.concatenate([jnp.zeros((na, 2), jnp.float32), anc], -1)[None]
    best = jnp.argmax(_multi_bbox_iou(gt_wh, anc_box), axis=1)

    bidx = jnp.arange(bs)
    pbox_at = jnp.stack([bx, by, bw, bh], axis=2)[bidx, best, :, gj, gi]
    tconf = _multi_bbox_iou(t, pbox_at)

    conf_mask = conf_mask.at[bidx, best, gj, gi].set(mod.object_scale)
    target_conf = jnp.zeros((bs, na, S, S)).at[bidx, best, gj, gi].set(tconf)

    if epoch < 1:
        coord_mask = jnp.ones((bs, na, S, S))
        tx = jnp.full((bs, na, S, S), 0.5)
        ty = jnp.full((bs, na, S, S), 0.5)
        tw = jnp.zeros((bs, na, S, S))
        th = jnp.zeros((bs, na, S, S))
    else:
        coord_mask = jnp.zeros((bs, na, S, S)).at[bidx, best, gj, gi].set(1.0)
        tx = jnp.zeros((bs, na, S, S))
        ty = jnp.zeros((bs, na, S, S))
        tw = jnp.zeros((bs, na, S, S))
        th = jnp.zeros((bs, na, S, S))
    tx = tx.at[bidx, best, gj, gi].set(gx - gi)
    ty = ty.at[bidx, best, gj, gi].set(gy - gj)
    tw = tw.at[bidx, best, gj, gi].set(jnp.log(gw / anc[best, 0]))
    th = th.at[bidx, best, gj, gi].set(jnp.log(gh / anc[best, 1]))

    cm = jnp.sqrt(conf_mask)
    lx = mod.cs * jnp.sum((px * coord_mask - tx * coord_mask) ** 2) / 2.0
    ly = mod.cs * jnp.sum((py * coord_mask - ty * coord_mask) ** 2) / 2.0
    lw = mod.cs * jnp.sum((pw * coord_mask - tw * coord_mask) ** 2) / 2.0
    lh = mod.cs * jnp.sum((ph * coord_mask - th * coord_mask) ** 2) / 2.0
    lc = jnp.sum((pconf * cm - target_conf * cm) ** 2) / 2.0
    return lx + ly + lw + lh + lc, lx, ly, lw, lh, lc


if __name__ == "__main__":
    cfg = {
        'object_scale': 5.0,
        'no_object_scale': 1.0,
        'anchors': '1.3221,1.73145,3.19275,4.00944,5.05587,8.09892',  # na = 3
        'coord_scale': 1.0,
        'sil_thresh': 0.6,
        'time': False,
        'debug': False,
    }
    loss_mod = RegionLossNoClass1BboxPallas(cfg)

    bs, S = 2, 16
    na = loss_mod.na
    key = jax.random.PRNGKey(0)
    kp, kt = jax.random.split(key)
    pred = jax.random.normal(kp, (bs, na * 5, S, S), dtype=jnp.float32)
    target = jax.random.uniform(kt, (bs, 4), dtype=jnp.float32,
                                minval=0.2, maxval=0.8)

    ok = True
    for epoch in (0, 1):
        loss_mod.epoch = epoch
        out = loss_mod(pred, target)
        out = jax.block_until_ready(out)
        ref = _reference_forward(loss_mod, pred, target, epoch=epoch)
        for got, want in zip(out, ref):
            g, w = float(got), float(want)
            if not (abs(g - w) <= 1e-2 + 5e-3 * abs(w)):
                ok = False
                print("MISMATCH epoch=%d got=%f want=%f" % (epoch, g, w))
    assert ok
    print("KERNEL_OK")
</pallas_src>

<mosaic_0001>
module attributes {stable_mosaic.version = 11 : i64} {
  func.func @_region_loss_kernel(%arg0: i32, %arg1: memref<6x6xf32, #tpu.memory_space<vmem>>, %arg2: memref<2x256xf32, #tpu.memory_space<vmem>>, %arg3: memref<6x1280xf32, #tpu.memory_space<vmem>>, %arg4: memref<8x128xf32, #tpu.memory_space<vmem>>) attributes {dimension_semantics = [#tpu.dimension_semantics<parallel>], iteration_bounds = array<i64: 1>, scalar_prefetch = 0 : i64, scratch_operands = 0 : i64, tpu.core_type = #tpu.core_type<tc>, window_params = [{transform_indices = @transform_0, window_bounds = array<i64: 6, 6>}, {pipeline_mode = #tpu.pipeline_mode<synchronous>, transform_indices = @transform_1, window_bounds = array<i64: 2, 256>}, {transform_indices = @transform_2, window_bounds = array<i64: 6, 1280>}, {transform_indices = @transform_3, window_bounds = array<i64: 8, 128>}]} {
    %c0 = arith.constant 0 : index
    %c0_0 = arith.constant 0 : index
    %0 = vector.load %arg2[%c0, %c0_0] : memref<2x256xf32, #tpu.memory_space<vmem>>, vector<1x256xf32>
    %c1 = arith.constant 1 : index
    %c0_1 = arith.constant 0 : index
    %1 = vector.load %arg2[%c1, %c0_1] : memref<2x256xf32, #tpu.memory_space<vmem>>, vector<1x256xf32>
    %c0_2 = arith.constant 0 : index
    %c0_3 = arith.constant 0 : index
    %2 = vector.load %arg1[%c0_2, %c0_3] : memref<6x6xf32, #tpu.memory_space<vmem>>, vector<6x6xf32>
    %3 = vector.extract_strided_slice %2 {offsets = [0, 0], sizes = [6, 1], strides = [1, 1]} : vector<6x6xf32> to vector<6x1xf32>
    %4 = vector.extract_strided_slice %2 {offsets = [0, 1], sizes = [6, 1], strides = [1, 1]} : vector<6x6xf32> to vector<6x1xf32>
    %5 = vector.extract_strided_slice %2 {offsets = [0, 2], sizes = [6, 1], strides = [1, 1]} : vector<6x6xf32> to vector<6x1xf32>
    %6 = vector.extract_strided_slice %2 {offsets = [0, 3], sizes = [6, 1], strides = [1, 1]} : vector<6x6xf32> to vector<6x1xf32>
    %7 = vector.extract_strided_slice %2 {offsets = [0, 4], sizes = [6, 1], strides = [1, 1]} : vector<6x6xf32> to vector<6x1xf32>
    %8 = vector.extract_strided_slice %2 {offsets = [0, 5], sizes = [6, 1], strides = [1, 1]} : vector<6x6xf32> to vector<6x1xf32>
    %c0_4 = arith.constant 0 : index
    %c0_5 = arith.constant 0 : index
    %9 = vector.load %arg3[%c0_4, %c0_5] : memref<6x1280xf32, #tpu.memory_space<vmem>>, vector<6x256xf32>
    %10 = arith.negf %9 : vector<6x256xf32>
    %11 = math.exp %10 : vector<6x256xf32>
    %cst = arith.constant 1.000000e+00 : f32
    %12 = vector.broadcast %cst : f32 to vector<6x256xf32>
    %13 = arith.addf %12, %11 : vector<6x256xf32>
    %14 = arith.divf %12, %13 : vector<6x256xf32>
    %c0_6 = arith.constant 0 : index
    %c256 = arith.constant 256 : index
    %15 = vector.load %arg3[%c0_6, %c256] : memref<6x1280xf32, #tpu.memory_space<vmem>>, vector<6x256xf32>
    %16 = arith.negf %15 : vector<6x256xf32>
    %17 = math.exp %16 : vector<6x256xf32>
    %cst_7 = arith.constant 1.000000e+00 : f32
    %18 = vector.broadcast %cst_7 : f32 to vector<6x256xf32>
    %19 = arith.addf %18, %17 : vector<6x256xf32>
    %20 = arith.divf %18, %19 : vector<6x256xf32>
    %c0_8 = arith.constant 0 : index
    %c512 = arith.constant 512 : index
    %21 = vector.load %arg3[%c0_8, %c512] : memref<6x1280xf32, #tpu.memory_space<vmem>>, vector<6x256xf32>
    %c0_9 = arith.constant 0 : index
    %c768 = arith.constant 768 : index
    %22 = vector.load %arg3[%c0_9, %c768] : memref<6x1280xf32, #tpu.memory_space<vmem>>, vector<6x256xf32>
    %c0_10 = arith.constant 0 : index
    %c1024 = arith.constant 1024 : index
    %23 = vector.load %arg3[%c0_10, %c1024] : memref<6x1280xf32, #tpu.memory_space<vmem>>, vector<6x256xf32>
    %24 = arith.negf %23 : vector<6x256xf32>
    %25 = math.exp %24 : vector<6x256xf32>
    %cst_11 = arith.constant 1.000000e+00 : f32
    %26 = vector.broadcast %cst_11 : f32 to vector<6x256xf32>
    %27 = arith.addf %26, %25 : vector<6x256xf32>
    %28 = arith.divf %26, %27 : vector<6x256xf32>
    %29 = vector.broadcast %0 : vector<1x256xf32> to vector<6x256xf32>
    %30 = arith.addf %14, %29 : vector<6x256xf32>
    %31 = vector.broadcast %1 : vector<1x256xf32> to vector<6x256xf32>
    %32 = arith.addf %20, %31 : vector<6x256xf32>
    %33 = math.exp %21 : vector<6x256xf32>
    %34 = vector.broadcast %7 : vector<6x1xf32> to vector<6x256xf32>
    %35 = arith.mulf %33, %34 : vector<6x256xf32>
    %36 = math.exp %22 : vector<6x256xf32>
    %37 = vector.broadcast %8 : vector<6x1xf32> to vector<6x256xf32>
    %38 = arith.mulf %36, %37 : vector<6x256xf32>
    %cst_12 = arith.constant 5.000000e-01 : f32
    %39 = vector.broadcast %cst_12 : f32 to vector<6x1xf32>
    %40 = arith.mulf %5, %39 : vector<6x1xf32>
    %41 = arith.subf %3, %40 : vector<6x1xf32>
    %cst_13 = arith.constant 5.000000e-01 : f32
    %42 = vector.broadcast %cst_13 : f32 to vector<6x256xf32>
    %43 = arith.mulf %35, %42 : vector<6x256xf32>
    %44 = arith.subf %30, %43 : vector<6x256xf32>
    %45 = vector.broadcast %41 : vector<6x1xf32> to vector<6x256xf32>
    %46 = arith.minimumf %45, %44 : vector<6x256xf32>
    %cst_14 = arith.constant 5.000000e-01 : f32
    %47 = vector.broadcast %cst_14 : f32 to vector<6x1xf32>
    %48 = arith.mulf %5, %47 : vector<6x1xf32>
    %49 = arith.addf %3, %48 : vector<6x1xf32>
    %cst_15 = arith.constant 5.000000e-01 : f32
    %50 = vector.broadcast %cst_15 : f32 to vector<6x256xf32>
    %51 = arith.mulf %35, %50 : vector<6x256xf32>
    %52 = arith.addf %30, %51 : vector<6x256xf32>
    %53 = vector.broadcast %49 : vector<6x1xf32> to vector<6x256xf32>
    %54 = arith.maximumf %53, %52 : vector<6x256xf32>
    %cst_16 = arith.constant 5.000000e-01 : f32
    %55 = vector.broadcast %cst_16 : f32 to vector<6x1xf32>
    %56 = arith.mulf %6, %55 : vector<6x1xf32>
    %57 = arith.subf %4, %56 : vector<6x1xf32>
    %cst_17 = arith.constant 5.000000e-01 : f32
    %58 = vector.broadcast %cst_17 : f32 to vector<6x256xf32>
    %59 = arith.mulf %38, %58 : vector<6x256xf32>
    %60 = arith.subf %32, %59 : vector<6x256xf32>
    %61 = vector.broadcast %57 : vector<6x1xf32> to vector<6x256xf32>
    %62 = arith.minimumf %61, %60 : vector<6x256xf32>
    %cst_18 = arith.constant 5.000000e-01 : f32
    %63 = vector.broadcast %cst_18 : f32 to vector<6x1xf32>
    %64 = arith.mulf %6, %63 : vector<6x1xf32>
    %65 = arith.addf %4, %64 : vector<6x1xf32>
    %cst_19 = arith.constant 5.000000e-01 : f32
    %66 = vector.broadcast %cst_19 : f32 to vector<6x256xf32>
    %67 = arith.mulf %38, %66 : vector<6x256xf32>
    %68 = arith.addf %32, %67 : vector<6x256xf32>
    %69 = vector.broadcast %65 : vector<6x1xf32> to vector<6x256xf32>
    %70 = arith.maximumf %69, %68 : vector<6x256xf32>
    %71 = vector.broadcast %5 : vector<6x1xf32> to vector<6x256xf32>
    %72 = arith.addf %71, %35 : vector<6x256xf32>
    %73 = arith.subf %54, %46 : vector<6x256xf32>
    %74 = arith.subf %72, %73 : vector<6x256xf32>
    %75 = vector.broadcast %6 : vector<6x1xf32> to vector<6x256xf32>
    %76 = arith.addf %75, %38 : vector<6x256xf32>
    %77 = arith.subf %70, %62 : vector<6x256xf32>
    %78 = arith.subf %76, %77 : vector<6x256xf32>
    %cst_20 = arith.constant 0.000000e+00 : f32
    %79 = vector.broadcast %cst_20 : f32 to vector<6x256xf32>
    %80 = arith.cmpf ole, %74, %79 : vector<6x256xf32>
    %cst_21 = arith.constant 0.000000e+00 : f32
    %81 = vector.broadcast %cst_21 : f32 to vector<6x256xf32>
    %82 = arith.cmpf ole, %78, %81 : vector<6x256xf32>
    %83 = arith.ori %80, %82 : vector<6x256xi1>
    %84 = arith.mulf %74, %78 : vector<6x256xf32>
    %cst_22 = arith.constant 0.000000e+00 : f32
    %85 = vector.broadcast %cst_22 : f32 to vector<6x256xf32>
    %86 = arith.select %83, %85, %84 : vector<6x256xi1>, vector<6x256xf32>
    %87 = arith.mulf %5, %6 : vector<6x1xf32>
    %88 = arith.mulf %35, %38 : vector<6x256xf32>
    %89 = vector.broadcast %87 : vector<6x1xf32> to vector<6x256xf32>
    %90 = arith.addf %89, %88 : vector<6x256xf32>
    %91 = arith.subf %90, %86 : vector<6x256xf32>
    %cst_23 = arith.constant 6.000000e-01 : f32
    %92 = vector.broadcast %cst_23 : f32 to vector<6x256xf32>
    %93 = arith.mulf %92, %91 : vector<6x256xf32>
    %94 = arith.cmpf ogt, %86, %93 : vector<6x256xf32>
    %cst_24 = arith.constant 0.000000e+00 : f32
    %cst_25 = arith.constant 1.000000e+00 : f32
    %95 = vector.broadcast %cst_24 : f32 to vector<6x256xf32>
    %96 = vector.broadcast %cst_25 : f32 to vector<6x256xf32>
    %97 = arith.select %94, %95, %96 : vector<6x256xi1>, vector<6x256xf32>
    %98 = arith.mulf %97, %28 : vector<6x256xf32>
    %99 = arith.mulf %98, %28 : vector<6x256xf32>
    %100 = vector.shape_cast %99 : vector<6x256xf32> to vector<1x6x256xf32>
    %cst_26 = arith.constant dense<0.000000e+00> : vector<1xf32>
    %101 = vector.multi_reduction <add>, %100, %cst_26 [1, 2] : vector<1x6x256xf32> to vector<1xf32>
    %102 = vector.shape_cast %101 : vector<1xf32> to vector<1x1x1xf32>
    %103 = vector.extract %102[0, 0, 0] : f32 from vector<1x1x1xf32>
    %104 = vector.broadcast %103 : f32 to vector<1x1xf32>
    %cst_27 = arith.constant 5.000000e-01 : f32
    %105 = vector.broadcast %cst_27 : f32 to vector<6x256xf32>
    %106 = arith.subf %14, %105 : vector<6x256xf32>
    %107 = arith.mulf %106, %106 : vector<6x256xf32>
    %108 = vector.shape_cast %107 : vector<6x256xf32> to vector<1x6x256xf32>
    %cst_28 = arith.constant dense<0.000000e+00> : vector<1xf32>
    %109 = vector.multi_reduction <add>, %108, %cst_28 [1, 2] : vector<1x6x256xf32> to vector<1xf32>
    %110 = vector.shape_cast %109 : vector<1xf32> to vector<1x1x1xf32>
    %111 = vector.extract %110[0, 0, 0] : f32 from vector<1x1x1xf32>
    %112 = vector.broadcast %111 : f32 to vector<1x1xf32>
    %cst_29 = arith.constant 5.000000e-01 : f32
    %113 = vector.broadcast %cst_29 : f32 to vector<6x256xf32>
    %114 = arith.subf %20, %113 : vector<6x256xf32>
    %115 = arith.mulf %114, %114 : vector<6x256xf32>
    %116 = vector.shape_cast %115 : vector<6x256xf32> to vector<1x6x256xf32>
    %cst_30 = arith.constant dense<0.000000e+00> : vector<1xf32>
    %117 = vector.multi_reduction <add>, %116, %cst_30 [1, 2] : vector<1x6x256xf32> to vector<1xf32>
    %118 = vector.shape_cast %117 : vector<1xf32> to vector<1x1x1xf32>
    %119 = vector.extract %118[0, 0, 0] : f32 from vector<1x1x1xf32>
    %120 = vector.broadcast %119 : f32 to vector<1x1xf32>
    %121 = arith.mulf %21, %21 : vector<6x256xf32>
    %122 = vector.shape_cast %121 : vector<6x256xf32> to vector<1x6x256xf32>
    %cst_31 = arith.constant dense<0.000000e+00> : vector<1xf32>
    %123 = vector.multi_reduction <add>, %122, %cst_31 [1, 2] : vector<1x6x256xf32> to vector<1xf32>
    %124 = vector.shape_cast %123 : vector<1xf32> to vector<1x1x1xf32>
    %125 = vector.extract %124[0, 0, 0] : f32 from vector<1x1x1xf32>
    %126 = vector.broadcast %125 : f32 to vector<1x1xf32>
    %127 = arith.mulf %22, %22 : vector<6x256xf32>
    %128 = vector.shape_cast %127 : vector<6x256xf32> to vector<1x6x256xf32>
    %cst_32 = arith.constant dense<0.000000e+00> : vector<1xf32>
    %129 = vector.multi_reduction <add>, %128, %cst_32 [1, 2] : vector<1x6x256xf32> to vector<1xf32>
    %130 = vector.shape_cast %129 : vector<1xf32> to vector<1x1x1xf32>
    %131 = vector.extract %130[0, 0, 0] : f32 from vector<1x1x1xf32>
    %132 = vector.broadcast %131 : f32 to vector<1x1xf32>
    %133 = tpu.iota {dimensions = array<i32: 0>} : vector<8x128xi32>
    %cst_33 = arith.constant 0.000000e+00 : f32
    %134 = vector.broadcast %cst_33 : f32 to vector<8x128xf32>
    %c0_i32 = arith.constant 0 : i32
    %135 = vector.broadcast %c0_i32 : i32 to vector<8x128xi32>
    %136 = arith.cmpi eq, %133, %135 : vector<8x128xi32>
    %137 = vector.shape_cast %112 : vector<1x1xf32> to vector<1x1xf32>
    %138 = vector.broadcast %137 : vector<1x1xf32> to vector<8x128xf32>
    %139 = arith.select %136, %138, %134 : vector<8x128xi1>, vector<8x128xf32>
    %c1_i32 = arith.constant 1 : i32
    %140 = vector.broadcast %c1_i32 : i32 to vector<8x128xi32>
    %141 = arith.cmpi eq, %133, %140 : vector<8x128xi32>
    %142 = vector.shape_cast %120 : vector<1x1xf32> to vector<1x1xf32>
    %143 = vector.broadcast %142 : vector<1x1xf32> to vector<8x128xf32>
    %144 = arith.select %141, %143, %139 : vector<8x128xi1>, vector<8x128xf32>
    %c2_i32 = arith.constant 2 : i32
    %145 = vector.broadcast %c2_i32 : i32 to vector<8x128xi32>
    %146 = arith.cmpi eq, %133, %145 : vector<8x128xi32>
    %147 = vector.shape_cast %126 : vector<1x1xf32> to vector<1x1xf32>
    %148 = vector.broadcast %147 : vector<1x1xf32> to vector<8x128xf32>
    %149 = arith.select %146, %148, %144 : vector<8x128xi1>, vector<8x128xf32>
    %c3_i32 = arith.constant 3 : i32
    %150 = vector.broadcast %c3_i32 : i32 to vector<8x128xi32>
    %151 = arith.cmpi eq, %133, %150 : vector<8x128xi32>
    %152 = vector.shape_cast %132 : vector<1x1xf32> to vector<1x1xf32>
    %153 = vector.broadcast %152 : vector<1x1xf32> to vector<8x128xf32>
    %154 = arith.select %151, %153, %149 : vector<8x128xi1>, vector<8x128xf32>
    %c4_i32 = arith.constant 4 : i32
    %155 = vector.broadcast %c4_i32 : i32 to vector<8x128xi32>
    %156 = arith.cmpi eq, %133, %155 : vector<8x128xi32>
    %157 = vector.shape_cast %104 : vector<1x1xf32> to vector<1x1xf32>
    %158 = vector.broadcast %157 : vector<1x1xf32> to vector<8x128xf32>
    %159 = arith.select %156, %158, %154 : vector<8x128xi1>, vector<8x128xf32>
    %c0_34 = arith.constant 0 : index
    %c0_35 = arith.constant 0 : index
    %160 = vector.load %arg4[%c0_34, %c0_35] : memref<8x128xf32, #tpu.memory_space<vmem>>, vector<8x128xf32>
    tpu.vector_store %arg4[%c0_34, %c0_35], %159 {strides = array<i32>} : memref<8x128xf32, #tpu.memory_space<vmem>>, vector<8x128xf32>,
    return
  }
  func.func @transform_0(%arg0: i32) -> (i32, i32) {
    %c0_i32 = arith.constant 0 : i32
    %c0_i32_0 = arith.constant 0 : i32
    return %arg0, %c0_i32 : i32, i32
  }
  func.func @transform_1(%arg0: i32) -> (i32, i32) {
    %c0_i32 = arith.constant 0 : i32
    %c0_i32_0 = arith.constant 0 : i32
    %c0_i32_1 = arith.constant 0 : i32
    return %c0_i32, %c0_i32_0 : i32, i32
  }
  func.func @transform_2(%arg0: i32) -> (i32, i32) {
    %c0_i32 = arith.constant 0 : i32
    %c0_i32_0 = arith.constant 0 : i32
    return %arg0, %c0_i32 : i32, i32
  }
  func.func @transform_3(%arg0: i32) -> (i32, i32) {
    %c0_i32 = arith.constant 0 : i32
    %c0_i32_0 = arith.constant 0 : i32
    return %arg0, %c0_i32 : i32, i32
  }
}

</mosaic_0001>

<bundles_post_ra>
// kernel: tile.7
= control target key start
LH: loop header
LB: loop body
LE: loop exit
PB: predicated region body
PF: predicated region fallthrough
CT: control target
= control target key end

     0   :  { %s10_s10 = smov 3  ;;  %vm12_vm0 = vcmask 23552   ;;  %s29_s11 = smov 3   ;;  %vm19_vm1 = vcmask 48152   ;;  %s49_s0 = inlined_call_operand.vmem [shape: f32[2,3,2], index: 0, kind: input, shape index: {}]   ;;  %s50_s1 = inlined_call_operand.vmem [shape: f32[6,2], index: 1, kind: output, shape index: {}]  }
   0x1   :  { %v27_v0 = vld [vmem:[%s49_s0 + $0x2] sm:$0x3]  ;;  %v8_v1 = vld [vmem:[%s49_s0] sm:$0x3]  ;;  %s15_s0 = smov 3 }
   0x2   :  { %7 = vst [vmem:[#allocation1 + $0x8] sm:$0x3] %v27_v0 }
   0x3   :  { %9 = vst [vmem:[#allocation1] sm:$0x3] %v8_v1 }
   0xa   :  { %v16_v2 = vld [vmem:[#allocation1 + $0x1] ss:$8 sm:%s15_s0]   ;;  %v11_v3 = vld [vmem:[#allocation1] ss:$8 sm:%s10_s10]  }
   0xb   :  { %17 = vrot.lane.b32.xlu0 %v16_v2, %s29_s11  ;;  %13 = vst.msk [vmem:[#allocation0] sm:$0x3] %vm12_vm0, %v11_v3  }
  0x7d   :  { %v18_v4 = vpop.permute.xlu0 %17  }
  0x7e   :  { %20 = vst.msk [vmem:[#allocation0] sm:$0x3] %vm19_vm1, %v18_v4  }
  0x85   :  { %v23_v5 = vld [vmem:[#allocation0] sm:$0x3] }
  0x86   :  { %26 = vst [vmem:[%s50_s1] sm:$0x3] %v23_v5 }

// kernel: _forward_impl.1
= control target key start
LH: loop header
LB: loop body
LE: loop exit
PB: predicated region body
PF: predicated region fallthrough
CT: control target
= control target key end

     0   :  { %v442_v1 = vmov 4   ;;  %s443_s14 = smov 126   ;;  %v444_v3 = vmov 5   ;;  %s445_s15 = smov 127   ;;  %v446_v4 = vmov 1   ;;  %v447_v5 = vmov 0   ;;  %s703_s0 = inlined_call_operand.vmem [shape: f32[6,6], index: 0, kind: input, shape index: {}]   ;;  %s704_s2 = inlined_call_operand.vmem [shape: f32[6,1280], index: 2, kind: input, shape index: {}]   ;;  %s705_s1 = inlined_call_operand.vmem [shape: f32[2,256], index: 1, kind: input, shape index: {}]   ;;  %s706_s3 = inlined_call_operand.vmem [shape: f32[8,128], index: 3, kind: output, shape index: {}]  }
   0x1   :  { %v17_v0 = vld [vmem:[%s703_s0] sm:$0x3f]  ;;  %402 = vset.pattern.permute.xlu1 %v442_v1  ;;  %405 = vset.pattern.permute.xlu0 %v446_v4  ;;  %v448_v9 = vmov 3   ;;  %v449_v10 = vmov 2   ;;  %v58_v13 = vld [vmem:[%s704_s2 + $0x10] sm:$0x3f] }
   0x2   :  { %v177_v2 = vmul.f32 0.5, %v17_v0  ;;  %162 = vperm.xlu1 %402, %v17_v0   ;;  %404 = vset.pattern.permute.xlu2 %v447_v5  ;;  %v59_v14 = vld [vmem:[%s704_s2 + $0x18] sm:$0x3f]  ;;  %v18_v15 = vld [vmem:[%s704_s2] sm:$0x3f] }
   0x3   :  { %v375_v16 = vmul.f32 -1.442695, %v58_v13  ;;  %v19_v17 = vld [vmem:[%s704_s2 + $0x8] sm:$0x3f]  ;;  %v376_v18 = vmul.f32 -1.442695, %v59_v14 }
   0x4   :  { %179 = vrot.lane.b32.xlu0 %v177_v2, %s443_s14  ;;  %v373_v19 = vmul.f32 -1.442695, %v18_v15  ;;  %v374_v20 = vmul.f32 -1.442695, %v19_v17  ;;  %v513_v35 = vld [vmem:[%s704_s2 + $0x20] sm:$0x3f] }
   0x5   :  { %410 = vpow2.f32 %v375_v16  ;;  %v522_v40 = vld [vmem:[%s704_s2 + $0x28] sm:$0x3f]  ;;  %v156_v41 = vmul.f32 1.442695, %v513_v35  ;;  %v102_v42 = vld [vmem:[%s704_s2 + $0x40] sm:$0x3f] }
   0x6   :  { %412 = vpow2.f32 %v376_v18  ;;  %v103_v44 = vld [vmem:[%s704_s2 + $0x48] sm:$0x3f]  ;;  %v158_v46 = vmul.f32 1.442695, %v522_v40  ;;  %v377_v49 = vmul.f32 -1.442695, %v102_v42  ;;  %v323_v62 = vmul.f32 %v522_v40, %v522_v40 }
   0x7   :  { %414 = vpow2.f32 %v373_v19  ;;  %v378_v50 = vmul.f32 -1.442695, %v103_v44  ;;  %v598_v13 = vld [vmem:[%s704_s2 + $0x38] sm:$0x3f] }
   0x8   :  { %416 = vpow2.f32 %v374_v20  ;;  %v14_v42 = vld [vmem:[%s705_s1] ss:$2 sm:$0x3] }
   0xa   :  { %403 = vset.pattern.permute.xlu1 %v444_v3 }
   0xb   :  { %172 = vperm.xlu1 %403, %v17_v0   ;;  %v411_v21 = vpop.eup %410 }
   0xc   :  { %252 = vrot.lane.b32.xlu0 %v17_v0, %s445_s15  ;;  %v413_v22 = vpop.eup %412  ;;  %v486_v24 = vadd.f32 1.0, %v411_v21 }
   0xd   :  { %v415_v23 = vpop.eup %414  ;;  %v488_v26 = vadd.f32 1.0, %v413_v22 }
   0xe   :  { %v417_v25 = vpop.eup %416  ;;  %v490_v27 = vadd.f32 1.0, %v415_v23  ;;  %418 = vrcp.f32 %v486_v24  ;;  %vm73_vm0 = vweird.f32 %v486_v24  ;;  %v77_v53 = vand.u32 2147483647, %v486_v24 }
   0xf   :  { %v492_v28 = vadd.f32 1.0, %v417_v25  ;;  %420 = vrcp.f32 %v488_v26  ;;  %vm88_vm3 = vweird.f32 %v488_v26  ;;  %v79_v54 = vand.u32 2147483648, %v486_v24 }
  0x10   :  { %422 = vrcp.f32 %v490_v27  ;;  %vm33_vm2 = vweird.f32 %v490_v27  ;;  %v94_v55 = vand.u32 2147483648, %v488_v26  ;;  %v92_v59 = vand.u32 2147483647, %v488_v26 }
  0x11   :  { %424 = vrcp.f32 %v492_v28  ;;  %v37_v60 = vand.u32 2147483647, %v490_v27  ;;  %v39_v61 = vand.u32 2147483648, %v490_v27  ;;  %vm48_vm8 = vweird.f32 %v492_v28 }
  0x12   :  { %426 = vpow2.f32 %v156_v41  ;;  %v52_v63 = vand.u32 2147483647, %v492_v28  ;;  %v95_v5 = vor.u32 1.1754944e-38, %v94_v55  ;;  %vm578_vm11 = vcmp.eq.f32.partialorder %v77_v53, 8.507059e+37 }
  0x13   :  { %407 = vset.pattern.permute.xlu1 %v446_v4  ;;  %428 = vpow2.f32 %v377_v49  ;;  %v80_v4 = vor.u32 1.1754944e-38, %v79_v54  ;;  %vm93_vm12 = vcmp.eq.f32.partialorder %v92_v59, 8.507059e+37  ;;  %vm600_vm14 = vcmp.eq.f32.partialorder %v37_v60, 8.507059e+37 }
  0x14   :  { %v498_v29 = vpop.eup %418  ;;  %430 = vpow2.f32 %v378_v50  ;;  %v40_v16 = vor.u32 1.1754944e-38, %v39_v61  ;;  %vm604_vm15 = vcmp.eq.f32.partialorder %v52_v63, 8.507059e+37  ;;  %v144_v55 = vperm.slane %v14_v42, 1 }
  0x15   :  { %v500_v30 = vpop.eup %420  ;;  %v69_v33 = vmul.f32 %v498_v29, %v486_v24  ;;  %vm74_vm1 = vweird.f32 %v498_v29  ;;  %432 = vpow2.f32 %v158_v46  ;;  %v322_v61 = vmul.f32 %v513_v35, %v513_v35 }
  0x16   :  { %v502_v31 = vpop.eup %422  ;;  %v84_v34 = vmul.f32 %v500_v30, %v488_v26  ;;  %vm89_vm4 = vweird.f32 %v500_v30  ;;  %vm545_vm5 = vmor %vm73_vm0, %vm74_vm1  ;;  %v169_v26 = vmul.f32 1.442695, %v598_v13  ;;  %vm277_vm0 = vcmask 1045504  }
  0x17   :  { %v504_v32 = vpop.eup %424  ;;  %v29_v36 = vmul.f32 %v502_v31, %v490_v27  ;;  %v70_v38 = vsub.f32 1.0, %v69_v33  ;;  %vm34_vm6 = vweird.f32 %v502_v31  ;;  %vm554_vm7 = vmor %vm88_vm3, %vm89_vm4 }
  0x18   :  { %v44_v37 = vmul.f32 %v504_v32, %v492_v28  ;;  %v85_v39 = vsub.f32 1.0, %v84_v34  ;;  %vm49_vm9 = vweird.f32 %v504_v32  ;;  %v427_v1 = vpop.eup %426  ;;  %vm566_vm10 = vmor %vm33_vm2, %vm34_vm6 }
  0x19   :  { %v30_v43 = vsub.f32 1.0, %v29_v36  ;;  %v71_v47 = vmul.f32 %v498_v29, %v70_v38  ;;  %vm589_vm13 = vmor %vm48_vm8, %vm49_vm9  ;;  %v429_v14 = vpop.eup %428 }
  0x1a   :  { %v45_v45 = vsub.f32 1.0, %v44_v37  ;;  %v86_v48 = vmul.f32 %v500_v30, %v85_v39  ;;  %v431_v19 = vpop.eup %430 }
  0x1b   :  { %v31_v51 = vmul.f32 %v502_v31, %v30_v43  ;;  %v72_v56 = vadd.f32 %v498_v29, %v71_v47  ;;  %v622_v34 = vadd.f32 1.0, %v431_v19  ;;  %v433_v36 = vpop.eup %432 }
  0x1c   :  { %v46_v52 = vmul.f32 %v504_v32, %v45_v45  ;;  %v87_v58 = vadd.f32 %v500_v30, %v86_v48  ;;  %v372_v48 = vld [vmem:[%s705_s1 + $0x1] ss:$2 sm:$0x3] }
  0x1d   :  { %v32_v2 = vadd.f32 %v502_v31, %v31_v51  ;;  %v151_v60 = vperm.slane %v372_v48, 1  ;;  %vm132_vm3 = vweird.f32 %v622_v34 }
  0x1e   :  { %v47_v3 = vadd.f32 %v504_v32, %v46_v52  ;;  %v143_v52 = vperm.slane %v14_v42, 0 }
  0x1f   :  { %v36_v21 = vsel %vm566_vm10, %v502_v31, %v32_v2 }
  0x20   :  { %v51_v25 = vsel %vm589_vm13, %v504_v32, %v47_v3 }
  0x74   :  { %v163_v20 = vpop.permute.xlu1 %162 }
  0x75   :  { %v165_v50 = vmul.f32 %v427_v1, %v163_v20  ;;  %v166_v51 = vmul.f32 %v433_v36, %v163_v20 }
  0x76   :  { %v180_v6 = vpop.permute.xlu0 %179 }
  0x77   :  { %v182_v7 = vsub.f32 %v17_v0, %v180_v6  ;;  %v194_v8 = vadd.f32 %v180_v6, %v17_v0  ;;  %v183_v1 = vmul.f32 0.5, %v165_v50  ;;  %v184_v2 = vmul.f32 0.5, %v166_v51 }
  0x78   :  { %v324_v6 = vsel %vm277_vm0, %v322_v61, 0.0 }
  0x79   :  { %217 = vperm.xlu1 %407, %v194_v8   ;;  %209 = vperm.xlu0 %405, %v182_v7  }
  0x7a   :  { %189 = vperm.xlu2 %404, %v182_v7   ;;  %v573_v7 = vld [vmem:[%s704_s2 + $0x30] sm:$0x3f] }
  0x7b   :  { %v167_v22 = vmul.f32 1.442695, %v573_v7 }
  0x7d   :  { %434 = vpow2.f32 %v167_v22  ;;  %v173_v46 = vpop.permute.xlu1 %172 }
  0x7e   :  { %v253_v11 = vpop.permute.xlu0 %252  ;;  %436 = vpow2.f32 %v169_v26 }
  0x7f   :  { %v255_v12 = vmul.f32 %v253_v11, %v17_v0 }
  0x81   :  { %408 = vset.pattern.permute.xlu1 %v448_v9  ;;  %409 = vset.pattern.permute.xlu0 %v449_v10 }
  0x82   :  { %199 = vperm.xlu2 %404, %v194_v8   ;;  %233 = vperm.xlu1 %408, %v17_v0   ;;  %v76_v8 = vsel %vm545_vm5, %v498_v29, %v72_v56  ;;  %v618_v29 = vadd.f32 1.0, %v429_v14 }
  0x83   :  { %v81_v23 = vsel %vm578_vm11, %v80_v4, %v76_v8  ;;  %v435_v54 = vpop.eup %434  ;;  %v325_v8 = vsel %vm277_vm0, %v323_v62, 0.0 }
  0x84   :  { %v381_v27 = vadd.f32 -0.5, %v81_v23  ;;  %438 = vrcp.f32 %v618_v29  ;;  %v437_v57 = vpop.eup %436  ;;  %v175_v3 = vmul.f32 %v435_v54, %v173_v46  ;;  %v326_v14 = vadd.f32 %v325_v8, %v324_v6 }
  0x85   :  { %440 = vrcp.f32 %v622_v34  ;;  %vm117_vm1 = vweird.f32 %v618_v29  ;;  %v121_v61 = vand.u32 2147483647, %v618_v29 }
  0x86   :  { %v308_v31 = vmul.f32 %v381_v27, %v381_v27  ;;  %v204_v11 = vmul.f32 0.5, %v175_v3 }
  0x87   :  { %vm122_vm13 = vcmp.eq.f32.partialorder %v121_v61, 8.507059e+37 }
  0x88   :  { %v310_v38 = vsel %vm277_vm0, %v308_v31, 0.0 }
  0x8a   :  { %406 = vset.pattern.permute.xlu2 %v449_v10  ;;  %v91_v10 = vsel %vm554_vm7, %v500_v30, %v87_v58  ;;  %v41_v30 = vsel %vm600_vm14, %v40_v16, %v36_v21  ;;  %v150_v58 = vperm.slane %v372_v48, 0  ;;  %v640_v59 = vpop.eup %438 }
  0x8b   :  { %223 = vperm.xlu2 %406, %v17_v0   ;;  %v54_v0 = vand.u32 2147483648, %v492_v28  ;;  %v96_v24 = vsel %vm93_vm12, %v95_v5, %v91_v10  ;;  %v379_v32 = vadd.f32 -0.5, %v41_v30  ;;  %v646_v63 = vpop.eup %440  ;;  %v176_v5 = vmul.f32 %v437_v57, %v173_v46 }
  0x8c   :  { %v382_v28 = vadd.f32 -0.5, %v96_v24  ;;  %v154_v10 = vadd.f32 %v150_v58, %v81_v23  ;;  %v155_v35 = vadd.f32 %v151_v60, %v96_v24  ;;  %v113_v40 = vmul.f32 %v640_v59, %v618_v29 }
  0x8d   :  { %v55_v18 = vor.u32 1.1754944e-38, %v54_v0  ;;  %v292_v44 = vmul.f32 %v379_v32, %v379_v32  ;;  %v147_v0 = vadd.f32 %v143_v52, %v41_v30  ;;  %v205_v15 = vmul.f32 0.5, %v176_v5 }
  0x8e   :  { %v309_v33 = vmul.f32 %v382_v28, %v382_v28  ;;  %v128_v17 = vmul.f32 %v646_v63, %v622_v34  ;;  %v206_v23 = vsub.f32 %v154_v10, %v204_v11  ;;  %v114_v28 = vsub.f32 1.0, %v113_v40 }
  0x8f   :  { %v56_v37 = vsel %vm604_vm15, %v55_v18, %v51_v25  ;;  %v294_v49 = vsel %vm277_vm0, %v292_v44, 0.0  ;;  %v195_v9 = vadd.f32 %v183_v1, %v147_v0  ;;  %v185_v18 = vsub.f32 %v147_v0, %v183_v1 }
  0x90   :  { %v311_v39 = vsel %vm277_vm0, %v309_v33, 0.0  ;;  %v380_v41 = vadd.f32 -0.5, %v56_v37  ;;  %v148_v4 = vadd.f32 %v144_v55, %v56_v37  ;;  %v214_v25 = vadd.f32 %v204_v11, %v154_v10 }
  0x91   :  { %v312_v43 = vadd.f32 %v311_v39, %v310_v38  ;;  %v215_v27 = vadd.f32 %v205_v15, %v155_v35  ;;  %v207_v24 = vsub.f32 %v155_v35, %v205_v15  ;;  %v129_v30 = vsub.f32 1.0, %v128_v17 }
  0x92   :  { %v293_v45 = vmul.f32 %v380_v41, %v380_v41  ;;  %v196_v19 = vadd.f32 %v184_v2, %v148_v4  ;;  %v186_v21 = vsub.f32 %v148_v4, %v184_v2  ;;  %v256_v44 = vmul.f32 %v175_v3, %v165_v50 }
  0x93   :  { %260 = vperm.xlu2 %406, %v255_v12   ;;  %v115_v46 = vmul.f32 %v640_v59, %v114_v28  ;;  %v130_v48 = vmul.f32 %v646_v63, %v129_v30  ;;  %vm118_vm2 = vweird.f32 %v640_v59  ;;  %v123_v57 = vand.u32 2147483648, %v618_v29 }
  0x94   :  { %v295_v53 = vsel %vm277_vm0, %v293_v45, 0.0  ;;  %v257_v45 = vmul.f32 %v176_v5, %v166_v51  ;;  %vm133_vm4 = vweird.f32 %v646_v63  ;;  %vm671_vm6 = vmor %vm117_vm1, %vm118_vm2  ;;  %v136_v1 = vand.u32 2147483647, %v622_v34 }
  0x95   :  { %v296_v56 = vadd.f32 %v295_v53, %v294_v49  ;;  %v116_v60 = vadd.f32 %v640_v59, %v115_v46  ;;  %v131_v0 = vadd.f32 %v646_v63, %v130_v48  ;;  %v138_v2 = vand.u32 2147483648, %v622_v34  ;;  %vm682_vm9 = vmor %vm132_vm3, %vm133_vm4 }
  0x96   :  { %v124_v10 = vor.u32 1.1754944e-38, %v123_v57  ;;  %vm137_vm14 = vcmp.eq.f32.partialorder %v136_v1, 8.507059e+37 }
  0x97   :  { %v139_v35 = vor.u32 1.1754944e-38, %v138_v2  ;;  %v135_v15 = vsel %vm682_vm9, %v646_v63, %v131_v0  ;;  %v336_v63 = vmul.f32 %v573_v7, %v573_v7 }
  0x99   :  { %v338_v30 = vsel %vm277_vm0, %v336_v63, 0.0 }
  0xac   :  { %297 = vadd.xlane.f32.xlu1 %v296_v56 }
  0xbc   :  { %313 = vadd.xlane.f32.xlu2 %v312_v43 }
  0xc4   :  { %327 = vadd.xlane.f32.xlu2 %v326_v14 }
  0xd4   :  { %v593_v12 = vpop.permute.xlu2 %189 }
  0xd5   :  { %v192_v31 = vmin.f32 %v593_v12, %v185_v18  ;;  %v193_v41 = vmin.f32 %v593_v12, %v186_v21  ;;  %v140_v18 = vsel %vm137_vm14, %v139_v35, %v135_v15 }
  0xdc   :  { %v633_v47 = vpop.permute.xlu2 %199 }
  0xdd   :  { %v202_v22 = vmax.f32 %v633_v47, %v195_v9  ;;  %v203_v33 = vmax.f32 %v633_v47, %v196_v19  ;;  %v120_v9 = vsel %vm671_vm6, %v640_v59, %v116_v60  ;;  %v450_v19 = vmov 1.0  }
  0xde   :  { %v125_v17 = vsel %vm122_vm13, %v124_v10, %v120_v9 }
  0xdf   :  { %v228_v42 = vsub.f32 %v202_v22, %v192_v31  ;;  %v229_v49 = vsub.f32 %v203_v33, %v193_v41 }
  0xe5   :  { %v224_v20 = vpop.permute.xlu2 %223 }
  0xe6   :  { %v226_v36 = vadd.f32 %v224_v20, %v165_v50  ;;  %v227_v43 = vadd.f32 %v224_v20, %v166_v51 }
  0xe8   :  { %v230_v52 = vsub.f32 %v226_v36, %v228_v42  ;;  %v231_v12 = vsub.f32 %v227_v43, %v229_v49 }
  0xea   :  { %vm242_vm5 = vcmp.le.f32.partialorder %v230_v52, 0.0  ;;  %vm243_vm10 = vcmp.le.f32.partialorder %v231_v12, 0.0 }
  0xeb   :  { %v218_v16 = vpop.permute.xlu1 %217  ;;  %v210_v26 = vpop.permute.xlu0 %209 }
  0xec   :  { %v220_v37 = vmax.f32 %v218_v16, %v214_v25  ;;  %v221_v32 = vmax.f32 %v218_v16, %v215_v27  ;;  %v212_v38 = vmin.f32 %v210_v26, %v206_v23  ;;  %v213_v39 = vmin.f32 %v210_v26, %v207_v24 }
  0xed   :  { %v261_v50 = vpop.permute.xlu2 %260  ;;  %v337_v24 = vmul.f32 %v598_v13, %v598_v13 }
  0xee   :  { %v238_v47 = vsub.f32 %v220_v37, %v212_v38  ;;  %v239_v54 = vsub.f32 %v221_v32, %v213_v39  ;;  %v264_v6 = vadd.f32 %v261_v50, %v257_v45 }
  0xef   :  { %v339_v31 = vsel %vm277_vm0, %v337_v24, 0.0 }
  0xf0   :  { %v340_v33 = vadd.f32 %v339_v31, %v338_v30 }
  0xf4   :  { %v234_v53 = vpop.permute.xlu1 %233 }
  0xf5   :  { %v236_v55 = vadd.f32 %v234_v53, %v175_v3  ;;  %v237_v56 = vadd.f32 %v234_v53, %v176_v5  ;;  %v263_v5 = vadd.f32 %v261_v50, %v256_v44 }
  0xf7   :  { %v240_v51 = vsub.f32 %v236_v55, %v238_v47  ;;  %v241_v58 = vsub.f32 %v237_v56, %v239_v54 }
  0xf9   :  { %vm244_vm7 = vcmp.le.f32.partialorder %v240_v51, 0.0  ;;  %vm245_vm8 = vcmp.le.f32.partialorder %v241_v58, 0.0  ;;  %v248_v3 = vmul.f32 %v240_v51, %v230_v52  ;;  %v249_v4 = vmul.f32 %v241_v58, %v231_v12 }
  0xfa   :  { %vm246_vm11 = vmor %vm242_vm5, %vm244_vm7 }
  0xfb   :  { %vm247_vm12 = vmor %vm243_vm10, %vm245_vm8  ;;  %v250_v8 = vsel %vm246_vm11, 0.0, %v248_v3 }
  0xfc   :  { %v251_v11 = vsel %vm247_vm12, 0.0, %v249_v4  ;;  %v265_v14 = vsub.f32 %v263_v5, %v250_v8  ;;  %v350_v5 = vlaneseq }
  0xfd   :  { %v266_v34 = vsub.f32 %v264_v6, %v251_v11 }
  0xfe   :  { %v267_v16 = vmul.f32 0.6, %v265_v14  ;;  %v351_v6 = vshrl.u32 %v350_v5, 7 }
  0xff   :  { %v268_v40 = vmul.f32 0.6, %v266_v34 }
 0x100   :  { %vm269_vm15 = vcmp.gt.f32.partialorder %v250_v8, %v267_v16  ;;  %vm355_vm2 = vcmp.eq.s32.totalorder %v351_v6, 1  ;;  %vm358_vm3 = vcmp.eq.s32.totalorder %v351_v6, 2  ;;  %vm361_vm4 = vcmp.eq.s32.totalorder %v351_v6, 3 }
 0x101   :  { %vm270_vm1 = vcmp.gt.f32.partialorder %v251_v11, %v268_v40  ;;  %v271_v20 = vsel %vm269_vm15, 0.0, %v450_v19  ;;  %vm364_vm5 = vcmp.eq.s32.totalorder %v351_v6, 4 }
 0x102   :  { %v272_v59 = vsel %vm270_vm1, 0.0, %v450_v19  ;;  %v273_v21 = vmul.f32 %v271_v20, %v125_v17 }
 0x103   :  { %v274_v22 = vmul.f32 %v272_v59, %v140_v18 }
 0x104   :  { %v275_v25 = vmul.f32 %v273_v21, %v125_v17 }
 0x105   :  { %v276_v23 = vmul.f32 %v274_v22, %v140_v18 }
 0x106   :  { %v278_v26 = vsel %vm277_vm0, %v275_v25, 0.0 }
 0x107   :  { %v279_v27 = vsel %vm277_vm0, %v276_v23, 0.0  ;;  %vm352_vm0 = vcmp.eq.s32.totalorder %v351_v6, 0 }
 0x108   :  { %v280_v28 = vadd.f32 %v279_v27, %v278_v26 }
 0x10a   :  { %281 = vadd.xlane.f32.xlu0 %v280_v28 }
 0x112   :  { %341 = vadd.xlane.f32.xlu0 %v340_v33 }
 0x11f   :  { %v298_v37 = vpop.xlane.xlu1 %297 }
 0x120   :  { %v299_v38 = vrot.slane %v298_v37, 4 }
 0x122   :  { %v300_v42 = vadd.f32 %v299_v38, %v298_v37 }
 0x124   :  { %v301_v44 = vrot.slane %v300_v42, 2 }
 0x126   :  { %v302_v49 = vadd.f32 %v301_v44, %v300_v42 }
 0x128   :  { %v303_v55 = vrot.slane %v302_v49, 1 }
 0x12a   :  { %v304_v60 = vadd.f32 %v303_v55, %v302_v49 }
 0x12f   :  { %v314_v36 = vpop.xlane.xlu2 %313 }
 0x130   :  { %v315_v41 = vrot.slane %v314_v36, 4 }
 0x132   :  { %v316_v7 = vadd.f32 %v315_v41, %v314_v36 }
 0x134   :  { %v317_v46 = vrot.slane %v316_v7, 2 }
 0x136   :  { %v318_v54 = vadd.f32 %v317_v46, %v316_v7 }
 0x137   :  { %v328_v32 = vpop.xlane.xlu2 %327 }
 0x138   :  { %v329_v39 = vrot.slane %v328_v32, 4  ;;  %v319_v58 = vrot.slane %v318_v54, 1 }
 0x13a   :  { %v330_v43 = vadd.f32 %v329_v39, %v328_v32  ;;  %v320_v2 = vadd.f32 %v319_v58, %v318_v54 }
 0x13c   :  { %v331_v13 = vrot.slane %v330_v43, 2 }
 0x13e   :  { %v332_v53 = vadd.f32 %v331_v13, %v330_v43 }
 0x140   :  { %v333_v57 = vrot.slane %v332_v53, 1 }
 0x142   :  { %v334_v0 = vadd.f32 %v333_v57, %v332_v53 }
 0x17d   :  { %v282_v45 = vpop.xlane.xlu0 %281 }
 0x17e   :  { %v283_v48 = vrot.slane %v282_v45, 4 }
 0x180   :  { %v284_v52 = vadd.f32 %v283_v48, %v282_v45 }
 0x182   :  { %v285_v47 = vrot.slane %v284_v52, 2 }
 0x184   :  { %v286_v56 = vadd.f32 %v285_v47, %v284_v52 }
 0x185   :  { %v342_v12 = vpop.xlane.xlu0 %341 }
 0x186   :  { %v343_v50 = vrot.slane %v342_v12, 4  ;;  %v287_v51 = vrot.slane %v286_v56, 1 }
 0x188   :  { %v344_v61 = vadd.f32 %v343_v50, %v342_v12  ;;  %v288_v62 = vadd.f32 %v287_v51, %v286_v56 }
 0x18a   :  { %v345_v1 = vrot.slane %v344_v61, 2  ;;  %383 = vpush %v288_v62 }
 0x18b   :  { %385 = vpush %v304_v60 }
 0x18c   :  { %v346_v3 = vadd.f32 %v345_v1, %v344_v61  ;;  %387 = vpush %v320_v2 }
 0x18d   :  { %389 = vpush %v334_v0 }
 0x18e   :  { %v347_v4 = vrot.slane %v346_v3, 1 }
 0x190   :  { %v348_v29 = vadd.f32 %v347_v4, %v346_v3 }
 0x192   :  { %391 = vpush %v348_v29 }
 0x1bb   :  { %s384_s1 = spop %383 }
 0x1bc   :  { %s386_s11 = spop %385  ;;  %v365_v15 = vstv %s384_s1 }
 0x1bd   :  { %v353_v8 = vstv %s386_s11  ;;  %s388_s12 = spop %387 }
 0x1be   :  { %v354_v9 = vsel %vm352_vm0, %v353_v8, 0.0  ;;  %v356_v10 = vstv %s388_s12  ;;  %s390_s13 = spop %389 }
 0x1bf   :  { %v357_v11 = vsel %vm355_vm2, %v356_v10, %v354_v9  ;;  %v359_v14 = vstv %s390_s13 }
 0x1c0   :  { %v360_v35 = vsel %vm358_vm3, %v359_v14, %v357_v11 }
 0x1c3   :  { %s392_s14 = spop %391 }
 0x1c4   :  { %v362_v34 = vstv %s392_s14 }
 0x1c5   :  { %v363_v16 = vsel %vm361_vm4, %v362_v34, %v360_v35 }
 0x1c6   :  { %v366_v40 = vsel %vm364_vm5, %v365_v15, %v363_v16 }
 0x1c7   :  { %367 = vst [vmem:[%s706_s3] sm:$0xff] %v366_v40 }

</bundles_post_ra>
